<compile_context>
chip_gen: v6e
topology: v6e:2x2x1
jax: 0.10.0
libtpu: 0.0.40
codegen_flags: <defaults>
</compile_context>

<pallas_src>
import functools

import jax
import jax.numpy as jnp
from jax.experimental import pallas as pl
from jax.experimental.pallas import tpu as pltpu

LANE = 128
SUBLANE = 8


def _round_up(x, m):
    return ((x + m - 1) // m) * m


def _slab_layout(state_size, layer_size, action_n):
    """Row offsets of (w1, b1, w2, b2, w3, b3, w4, b4) inside the param slab.

    Every segment starts on an 8-row (sublane) boundary and the slab is 128
    lanes wide, so the static in-kernel slices are aligned and cheap.
    """
    del action_n  # row layout does not depend on the action count
    seg_rows = [state_size, 1, layer_size, 1, layer_size, 1, layer_size, 1]
    offsets = []
    rows = 0
    for r in seg_rows:
        offsets.append(rows)
        rows += _round_up(r, SUBLANE)
    return offsets, rows


def pack_dqn_params(params):
    """One-time packing of w1..w4 / b1..b4 into a single (R, 128) fp32 slab.

    Call this once when the parameters change (e.g. after an optimizer step /
    target-network sync), NOT inside the per-step forward.
    """
    state_size, layer_size = params["w1"].shape
    action_n = params["w4"].shape[1]
    offsets, rows = _slab_layout(state_size, layer_size, action_n)
    segs = [params["w1"], params["b1"], params["w2"], params["b2"],
            params["w3"], params["b3"], params["w4"], params["b4"]]
    slab = jnp.zeros((rows, LANE), jnp.float32)
    for off, s in zip(offsets, segs):
        slab = slab.at[off:off + s.shape[0], :s.shape[1]].set(
            s.astype(jnp.float32))
    return slab


def _make_dqn_kernel(S, H, A, offsets):
    o_w1, o_b1, o_w2, o_b2, o_w3, o_b3, o_w4, o_b4 = offsets

    def kernel(x_ref, p_ref, o_ref):
        x = x_ref[...]
        # Static slices of the packed parameter slab (sublane-aligned starts).
        w1 = p_ref[o_w1:o_w1 + S, :H]
        b1 = p_ref[o_b1:o_b1 + 1, :H]
        w2 = p_ref[o_w2:o_w2 + H, :H]
        b2 = p_ref[o_b2:o_b2 + 1, :H]
        w3 = p_ref[o_w3:o_w3 + H, :H]
        b3 = p_ref[o_b3:o_b3 + 1, :H]
        w4 = p_ref[o_w4:o_w4 + H, :A]
        b4 = p_ref[o_b4:o_b4 + 1, :A]

        h = jnp.maximum(
            jnp.dot(x, w1, preferred_element_type=jnp.float32) + b1, 0.0)
        h = jnp.maximum(
            jnp.dot(h, w2, preferred_element_type=jnp.float32) + b2, 0.0)
        h = jnp.maximum(
            jnp.dot(h, w3, preferred_element_type=jnp.float32) + b3, 0.0)
        # Final layer, stored directly as the unpadded (tb, A) tile.
        o_ref[...] = jnp.dot(h, w4, preferred_element_type=jnp.float32) + b4

    return kernel


@functools.partial(
    jax.jit, static_argnames=("layer_size", "action_n", "batch_tile"))
def dqn_forward(x, packed_params, *, layer_size, action_n, batch_tile=1024):
    """Run the DQN MLP forward pass with a single Pallas TPU kernel.

    x:             (B, state_size) float32
    packed_params: (R, 128) float32 slab produced by pack_dqn_params.
    """
    B, S = x.shape
    H, A = int(layer_size), int(action_n)
    offsets, rows = _slab_layout(S, H, A)
    assert packed_params.shape == (rows, LANE), packed_params.shape

    # Batch-tile selection:
    #  * large default (1024): per-grid-step overhead (~0.35 us) dominates this
    #    kernel and the per-step working set is tiny, so big tiles are free;
    #  * for B >= 64, cap at ceil(B/2) rounded to 8 so the "parallel" batch
    #    axis has >= 2 steps and both v7x TensorCores get work.
    if B >= 64:
        tb = min(int(batch_tile), _round_up(-(-B // 2), SUBLANE))
    else:
        tb = min(int(batch_tile), _round_up(B, SUBLANE))
    grid = (pl.cdiv(B, tb),)

    kernel = _make_dqn_kernel(S, H, A, offsets)

    in_specs = [
        # x tile along the batch axis.  A partial final tile reads unspecified
        # rows past B; this is safe because every output row depends only on
        # its own input row and invalid rows are masked on writeback.
        pl.BlockSpec((tb, S), lambda i: (i, 0)),
        # Whole packed parameter slab, constant across the grid:
        # single-buffer it (no buffer swaps, half the constant VMEM).
        pl.BlockSpec((rows, LANE), lambda i: (0, 0),
                     pipeline_mode=pl.Buffered(buffer_count=1)),
    ]
    out_spec = pl.BlockSpec((tb, A), lambda i: (i, 0))

    # Advisory cost estimate (real action count; weights counted once).
    flops = 2 * B * (S * H + 2 * H * H + H * A)
    bytes_accessed = 4 * (B * S + B * A + rows * LANE)
    cost = pl.CostEstimate(flops=flops, transcendentals=0,
                           bytes_accessed=bytes_accessed)

    return pl.pallas_call(
        kernel,
        out_shape=jax.ShapeDtypeStruct((B, A), jnp.float32),
        grid_spec=pltpu.PrefetchScalarGridSpec(
            num_scalar_prefetch=0,
            grid=grid,
            in_specs=in_specs,
            out_specs=out_spec,
        ),
        compiler_params=pltpu.CompilerParams(
            dimension_semantics=("parallel",)),
        cost_estimate=cost,
    )(x, packed_params)


def init_dqn_params(key, state_size, layer_size, action_n):
    """Deterministic init mimicking PyTorch nn.Linear default
    (uniform(-1/sqrt(fan_in), 1/sqrt(fan_in))).  Weights stored as (in, out)."""
    dims = [(state_size, layer_size),
            (layer_size, layer_size),
            (layer_size, layer_size),
            (layer_size, action_n)]
    params = {}
    keys = jax.random.split(key, 2 * len(dims))
    for idx, (fan_in, fan_out) in enumerate(dims):
        bound = 1.0 / jnp.sqrt(jnp.float32(fan_in))
        w = jax.random.uniform(keys[2 * idx], (fan_in, fan_out),
                               dtype=jnp.float32, minval=-bound, maxval=bound)
        b = jax.random.uniform(keys[2 * idx + 1], (1, fan_out),
                               dtype=jnp.float32, minval=-bound, maxval=bound)
        params[f"w{idx + 1}"] = w
        params[f"b{idx + 1}"] = b
    return params


def dqn_forward_ref(x, params):
    """Pure-JAX reference for correctness checking."""
    h = jnp.maximum(x @ params["w1"] + params["b1"], 0.0)
    h = jnp.maximum(h @ params["w2"] + params["b2"], 0.0)
    h = jnp.maximum(h @ params["w3"] + params["b3"], 0.0)
    return h @ params["w4"] + params["b4"]


if __name__ == "__main__":
    # Small shapes implied by the module: flat state vector -> Q-values.
    state_size = 8
    layer_size = 32
    action_n = 4

    key = jax.random.PRNGKey(0)
    k_params, k_x1, k_x2 = jax.random.split(key, 3)
    params = init_dqn_params(k_params, state_size, layer_size, action_n)
    packed = pack_dqn_params(params)   # one-time packing, outside the hot path

    # Tolerance covers MXU f32 pass-precision differences between the kernel's
    # matmul path and XLA's dot; real layout/indexing bugs are O(0.1+).
    ATOL = RTOL = 5e-3

    # 1) Tiny inference-style batch (single-tile grid).
    x_small = jax.random.normal(k_x1, (8, state_size), dtype=jnp.float32)
    out_small = jax.block_until_ready(
        dqn_forward(x_small, packed, layer_size=layer_size, action_n=action_n))
    with jax.default_matmul_precision("highest"):
        ref_small = dqn_forward_ref(x_small, params)
    assert out_small.shape == (8, action_n)
    assert jnp.allclose(out_small, ref_small, atol=ATOL, rtol=RTOL)

    # 2) Replay-style batch, non-multiple of the tile: 2-step "parallel" grid
    #    (both v7x TCs) + partial-final-tile masked writeback path.
    x_big = jax.random.normal(k_x2, (300, state_size), dtype=jnp.float32)
    out_big = jax.block_until_ready(
        dqn_forward(x_big, packed, layer_size=layer_size, action_n=action_n))
    with jax.default_matmul_precision("highest"):
        ref_big = dqn_forward_ref(x_big, params)
    assert out_big.shape == (300, action_n)
    assert jnp.allclose(out_big, ref_big, atol=ATOL, rtol=RTOL)

    print("KERNEL_OK")
</pallas_src>

<mosaic_0001>
module attributes {stable_mosaic.version = 11 : i64} {
  func.func @kernel(%arg0: i32, %arg1: memref<8x8xf32, #tpu.memory_space<vmem>>, %arg2: memref<136x128xf32, #tpu.memory_space<vmem>>, %arg3: memref<8x4xf32, #tpu.memory_space<vmem>>) attributes {dimension_semantics = [#tpu.dimension_semantics<parallel>], iteration_bounds = array<i64: 1>, scalar_prefetch = 0 : i64, scratch_operands = 0 : i64, tpu.core_type = #tpu.core_type<tc>, window_params = [{transform_indices = @transform_0, window_bounds = array<i64: 8, 8>}, {pipeline_mode = #tpu.pipeline_mode<synchronous>, transform_indices = @transform_1, window_bounds = array<i64: 136, 128>}, {transform_indices = @transform_2, window_bounds = array<i64: 8, 4>}]} {
    %c0 = arith.constant 0 : index
    %c0_0 = arith.constant 0 : index
    %0 = vector.load %arg1[%c0, %c0_0] : memref<8x8xf32, #tpu.memory_space<vmem>>, vector<8x8xf32>
    %c0_1 = arith.constant 0 : index
    %c0_2 = arith.constant 0 : index
    %1 = vector.load %arg2[%c0_1, %c0_2] : memref<136x128xf32, #tpu.memory_space<vmem>>, vector<8x32xf32>
    %c8 = arith.constant 8 : index
    %c0_3 = arith.constant 0 : index
    %2 = vector.load %arg2[%c8, %c0_3] : memref<136x128xf32, #tpu.memory_space<vmem>>, vector<1x32xf32>
    %c16 = arith.constant 16 : index
    %c0_4 = arith.constant 0 : index
    %3 = vector.load %arg2[%c16, %c0_4] : memref<136x128xf32, #tpu.memory_space<vmem>>, vector<32x32xf32>
    %c48 = arith.constant 48 : index
    %c0_5 = arith.constant 0 : index
    %4 = vector.load %arg2[%c48, %c0_5] : memref<136x128xf32, #tpu.memory_space<vmem>>, vector<1x32xf32>
    %c56 = arith.constant 56 : index
    %c0_6 = arith.constant 0 : index
    %5 = vector.load %arg2[%c56, %c0_6] : memref<136x128xf32, #tpu.memory_space<vmem>>, vector<32x32xf32>
    %c88 = arith.constant 88 : index
    %c0_7 = arith.constant 0 : index
    %6 = vector.load %arg2[%c88, %c0_7] : memref<136x128xf32, #tpu.memory_space<vmem>>, vector<1x32xf32>
    %c96 = arith.constant 96 : index
    %c0_8 = arith.constant 0 : index
    %7 = vector.load %arg2[%c96, %c0_8] : memref<136x128xf32, #tpu.memory_space<vmem>>, vector<32x4xf32>
    %c128 = arith.constant 128 : index
    %c0_9 = arith.constant 0 : index
    %8 = vector.load %arg2[%c128, %c0_9] : memref<136x128xf32, #tpu.memory_space<vmem>>, vector<1x4xf32>
    %cst = arith.constant dense<0.000000e+00> : vector<8x32xf32>
    %9 = tpu.matmul %0, %1, %cst {dimension_numbers = #tpu.dot_dimension_numbers<[1], [0], [0], [1], [0, 0, 1, 1], [], []>} : vector<8x8xf32>, vector<8x32xf32>, vector<8x32xf32> -> vector<8x32xf32>
    %10 = vector.broadcast %2 : vector<1x32xf32> to vector<8x32xf32>
    %11 = arith.addf %9, %10 : vector<8x32xf32>
    %cst_10 = arith.constant 0.000000e+00 : f32
    %12 = vector.broadcast %cst_10 : f32 to vector<8x32xf32>
    %13 = arith.maximumf %11, %12 : vector<8x32xf32>
    %cst_11 = arith.constant dense<0.000000e+00> : vector<8x32xf32>
    %14 = tpu.matmul %13, %3, %cst_11 {dimension_numbers = #tpu.dot_dimension_numbers<[1], [0], [0], [1], [0, 0, 1, 1], [], []>} : vector<8x32xf32>, vector<32x32xf32>, vector<8x32xf32> -> vector<8x32xf32>
    %15 = vector.broadcast %4 : vector<1x32xf32> to vector<8x32xf32>
    %16 = arith.addf %14, %15 : vector<8x32xf32>
    %cst_12 = arith.constant 0.000000e+00 : f32
    %17 = vector.broadcast %cst_12 : f32 to vector<8x32xf32>
    %18 = arith.maximumf %16, %17 : vector<8x32xf32>
    %cst_13 = arith.constant dense<0.000000e+00> : vector<8x32xf32>
    %19 = tpu.matmul %18, %5, %cst_13 {dimension_numbers = #tpu.dot_dimension_numbers<[1], [0], [0], [1], [0, 0, 1, 1], [], []>} : vector<8x32xf32>, vector<32x32xf32>, vector<8x32xf32> -> vector<8x32xf32>
    %20 = vector.broadcast %6 : vector<1x32xf32> to vector<8x32xf32>
    %21 = arith.addf %19, %20 : vector<8x32xf32>
    %cst_14 = arith.constant 0.000000e+00 : f32
    %22 = vector.broadcast %cst_14 : f32 to vector<8x32xf32>
    %23 = arith.maximumf %21, %22 : vector<8x32xf32>
    %cst_15 = arith.constant dense<0.000000e+00> : vector<8x4xf32>
    %24 = tpu.matmul %23, %7, %cst_15 {dimension_numbers = #tpu.dot_dimension_numbers<[1], [0], [0], [1], [0, 0, 1, 1], [], []>} : vector<8x32xf32>, vector<32x4xf32>, vector<8x4xf32> -> vector<8x4xf32>
    %25 = vector.broadcast %8 : vector<1x4xf32> to vector<8x4xf32>
    %26 = arith.addf %24, %25 : vector<8x4xf32>
    %c0_16 = arith.constant 0 : index
    %c0_17 = arith.constant 0 : index
    %27 = vector.load %arg3[%c0_16, %c0_17] : memref<8x4xf32, #tpu.memory_space<vmem>>, vector<8x4xf32>
    tpu.vector_store %arg3[%c0_16, %c0_17], %26 {strides = array<i32>} : memref<8x4xf32, #tpu.memory_space<vmem>>, vector<8x4xf32>,
    return
  }
  func.func @transform_0(%arg0: i32) -> (i32, i32) {
    %c0_i32 = arith.constant 0 : i32
    %c0_i32_0 = arith.constant 0 : i32
    return %arg0, %c0_i32 : i32, i32
  }
  func.func @transform_1(%arg0: i32) -> (i32, i32) {
    %c0_i32 = arith.constant 0 : i32
    %c0_i32_0 = arith.constant 0 : i32
    %c0_i32_1 = arith.constant 0 : i32
    return %c0_i32, %c0_i32_0 : i32, i32
  }
  func.func @transform_2(%arg0: i32) -> (i32, i32) {
    %c0_i32 = arith.constant 0 : i32
    %c0_i32_0 = arith.constant 0 : i32
    return %arg0, %c0_i32 : i32, i32
  }
}

</mosaic_0001>

<bundles_post_ra>
// kernel: dqn_forward.1
= control target key start
LH: loop header
LB: loop body
LE: loop exit
PB: predicated region body
PF: predicated region fallthrough
CT: control target
= control target key end

     0   :  { %7 = vsyncpa [#allocation3], 0  ;;  %s526_s0 = inlined_call_operand.hbm [shape: f32[8,8], index: 0, kind: input, shape index: {}]   ;;  %s527_s1 = inlined_call_operand.hbm [shape: f32[136,128], index: 1, kind: input, shape index: {}]   ;;  %s528_s2 = inlined_call_operand.vmem [shape: f32[8,4], index: 2, kind: output, shape index: {}]  }
   0x1   :  { %8 = vsyncpa [#allocation5], 0  ;;  %s489_s9 = smov [#allocation2]   ;;  %s490_s11 = smov [#allocation4]  }
   0x2   :  { %s15_s10 = sshll.u32 %s489_s9, 4  ;;  %s24_s12 = sshll.u32 %s490_s11, 4  ;;  %s16_s10 = int_to_ptr.vmem [resolvable:$true] %s15_s10  ;;  %s25_s12 = int_to_ptr.vmem [resolvable:$true] %s24_s12 }
   0x3   :  { %s453_s13 = scalar_lea.vmem %s16_s10, 128  ;;  %p458_p1 = scmp.lt.s32.totalorder %s16_s10, %s16_s10 }
   0x4   :  { %p454_p0 = scmp.ne.s32.totalorder %s16_s10, %s453_s13  ;;  %p459_p2 = scmp.lt.s32.totalorder %s453_s13, %s453_s13 }
   0x6   :  { %p460_p3 = por %p459_p2, %p458_p1 }
   0x8   :  { %p461_p4 = pnand %p460_p3, %p454_p0 }
   0xa   :  { %464 = shalt.err (!%p461_p4)
}
   0xb   :  { %18 = dma.hbm_to_vmem [thread:$0]  %s526_s0, 128, %s16_s10, [#allocation3]  }
   0xc   :  { %s473_s16 = scalar_lea.vmem %s25_s12, 2176  ;;  %p478_p6 = scmp.lt.s32.totalorder %s25_s12, %s25_s12 }
   0xd   :  { %p474_p5 = scmp.ne.s32.totalorder %s25_s12, %s473_s16  ;;  %p479_p7 = scmp.lt.s32.totalorder %s473_s16, %s473_s16 }
   0xf   :  { %p480_p8 = por %p479_p7, %p478_p6 }
  0x11   :  { %p481_p9 = pnand %p480_p8, %p474_p5 }
  0x13   :  { %484 = shalt.err (!%p481_p9)
}
  0x14   :  { %s491_s17 = smov 128   ;;  %s492_s18 = smov 8  }
  0x15   :  { %30 = dma.hbm_to_vmem [thread:$0]  %s527_s1, 2176, %s25_s12, [#allocation5], %s491_s17, %s491_s17, %s492_s18  }
  0x16   :  { %485 = dma.done.wait [#allocation3], 128  }
  0x17   :  { %486 = vsyncadd [#allocation3], 4294967168 }
  0x18   :  { %487 = dma.done.wait [#allocation5], 2176  }
  0x19   :  { %488 = vsyncadd [#allocation5], 4294965120  ;;  %v493_v0 = vmov 0.0   ;;  %vm494_vm0 = vmmov 0   ;;  %vm59_vm1 = vcmask 64512   ;;  %v38_v1 = vld [vmem:[#allocation4] sm:$0xff] }
  0x1a   :  { %401 = vmatprep.subr.mxu0 %v493_v0  ;;  %403 = vmatprep.mubr.msk.f32.mxu0 %vm494_vm0, %v493_v0  ;;  %v37_v2 = vld [vmem:[#allocation2] sm:$0xff]  ;;  %v43_v3 = vld [vmem:[#allocation4 + $0x28] sm:$0xff]  ;;  %v42_v4 = vld [vmem:[#allocation4 + $0x20] sm:$0xff]  ;;  %vm138_vm2 = vcmask 261120   ;;  %vm368_vm3 = vcmask 31744  }
  0x1b   :  { %406 = vmatprep.subr.mxu1 %v493_v0  ;;  %414 = vmatprep.mubr.msk.f32.mxu1 %vm494_vm0, %v493_v0  ;;  %v41_v5 = vld [vmem:[#allocation4 + $0x18] sm:$0xff]  ;;  %v40_v6 = vld [vmem:[#allocation4 + $0x10] sm:$0xff]  ;;  %v376_v8 = vld [vmem:[#allocation4 + $0x8] ss:$0 sm:$0xff] }
  0x1c   :  { %402 = vmatpush3.msra.mxu0 %v38_v1  ;;  %407 = vmatpush3.msra.mxu1 %v43_v3  ;;  %v48_v7 = vld [vmem:[#allocation4 + $0x50] sm:$0xff]  ;;  %v47_v13 = vld [vmem:[#allocation4 + $0x48] sm:$0xff]  ;;  %v46_v14 = vld [vmem:[#allocation4 + $0x40] sm:$0xff] }
  0x1d   :  { %404 = vmatmul.mubr.msk.f32.vlgmr.msra.gmra.mxu0 %vm59_vm1, %v37_v2  ;;  %408 = vmatprep.subr.mxu1 %v493_v0  ;;  %v45_v15 = vld [vmem:[#allocation4 + $0x38] sm:$0xff]  ;;  %v378_v17 = vld [vmem:[#allocation4 + $0x30] ss:$0 sm:$0xff]  ;;  %v51_v23 = vld [vmem:[#allocation4 + $0x68] sm:$0xff] }
  0x1e   :  { %417 = vmatprep.subr.mxu0 %v493_v0  ;;  %425 = vmatprep.mubr.msk.f32.mxu0 %vm494_vm0, %v493_v0  ;;  %v53_v16 = vld [vmem:[#allocation4 + $0x78] sm:$0xff]  ;;  %v52_v22 = vld [vmem:[#allocation4 + $0x70] sm:$0xff]  ;;  %v50_v24 = vld [vmem:[#allocation4 + $0x60] sm:$0xff] }
  0x1f   :  { %409 = vmatpush3.msra.mxu1 %v42_v4  ;;  %418 = vmatpush3.msra.mxu0 %v48_v7  ;;  %v380_v25 = vld [vmem:[#allocation4 + $0x58] ss:$0 sm:$0xff]  ;;  %v382_v30 = vld [vmem:[#allocation4 + $0x80] ss:$0 sm:$0xff] }
  0x20   :  { %410 = vmatprep.subr.mxu1 %v493_v0  ;;  %419 = vmatprep.subr.mxu0 %v493_v0 }
  0x21   :  { %411 = vmatpush3.msra.mxu1 %v41_v5  ;;  %420 = vmatpush3.msra.mxu0 %v47_v13 }
  0x22   :  { %412 = vmatprep.subr.mxu1 %v493_v0  ;;  %421 = vmatprep.subr.mxu0 %v493_v0 }
  0x23   :  { %413 = vmatpush3.msra.mxu1 %v40_v6  ;;  %422 = vmatpush3.msra.mxu0 %v46_v14 }
  0x24   :  { %428 = vmatprep.subr.mxu1 %v493_v0  ;;  %423 = vmatprep.subr.mxu0 %v493_v0 }
  0x25   :  { %424 = vmatpush3.msra.mxu0 %v45_v15 }
  0xdd   :  { %v129_v9 = vpop.f32.mrf.mxu0 }
  0xde   :  { %v130_v10 = vadd.f32 %v376_v8, %v129_v9 }
  0xdf   :  { %v405_v11 = vpop.f32.mrf.mxu0 }
  0xe0   :  { %v133_v12 = vmax.f32 %v130_v10, 0.0 }
  0xe2   :  { %415 = vmatmul.mubr.msk.f32.vlgmr.msra.gmra.mxu1 %vm138_vm2, %v133_v12 }
  0xe3   :  { %436 = vmatprep.mubr.msk.f32.mxu1 %vm494_vm0, %v493_v0  ;;  %429 = vmatpush3.msra.mxu1 %v53_v16 }
  0xe4   :  { %430 = vmatprep.subr.mxu1 %v493_v0 }
  0xe5   :  { %431 = vmatpush3.msra.mxu1 %v52_v22 }
  0xe6   :  { %432 = vmatprep.subr.mxu1 %v493_v0 }
  0xe7   :  { %433 = vmatpush3.msra.mxu1 %v51_v23 }
  0xe8   :  { %434 = vmatprep.subr.mxu1 %v493_v0 }
  0xe9   :  { %435 = vmatpush3.msra.mxu1 %v50_v24 }
 0x1a2   :  { %v208_v18 = vpop.f32.mrf.mxu1 }
 0x1a3   :  { %v209_v19 = vadd.f32 %v378_v17, %v208_v18 }
 0x1a4   :  { %v416_v20 = vpop.f32.mrf.mxu1 }
 0x1a5   :  { %v212_v21 = vmax.f32 %v209_v19, 0.0 }
 0x1a7   :  { %426 = vmatmul.mubr.msk.f32.vlgmr.msra.gmra.mxu0 %vm138_vm2, %v212_v21 }
 0x267   :  { %v286_v26 = vpop.f32.mrf.mxu0 }
 0x268   :  { %v287_v27 = vadd.f32 %v380_v25, %v286_v26 }
 0x269   :  { %v427_v28 = vpop.f32.mrf.mxu0 }
 0x26a   :  { %v290_v29 = vmax.f32 %v287_v27, 0.0 }
 0x26c   :  { %437 = vmatmul.mubr.msk.f32.vlgmr.msra.gmra.mxu1 %vm138_vm2, %v290_v29 }
 0x32c   :  { %v364_v31 = vpop.f32.mrf.mxu1 }
 0x32d   :  { %v365_v32 = vadd.f32 %v382_v30, %v364_v31 }
 0x32e   :  { %v438_v33 = vpop.f32.mrf.mxu1 }
 0x32f   :  { %369 = vst.msk [vmem:[%s528_s2] sm:$0xff] %vm368_vm3, %v365_v32 }
 0x330   :  { %374 = vsyncpa [#allocation3], 1 }
 0x331   :  { %375 = vsyncpa [#allocation5], 1 }

</bundles_post_ra>
